<compile_context>
chip_gen: v7x
topology: tpu7x:2x2x1
jax: 0.10.0
libtpu: 0.0.40
codegen_flags: <defaults>
</compile_context>

<pallas_src>
import jax
import jax.numpy as jnp
from jax.experimental import pallas as pl
from jax.experimental.pallas import tpu as pltpu


def _round_up(x, m):
    return ((x + m - 1) // m) * m


def _vmem_capacity_bytes():
    """Per-core VMEM capacity; fall back to the smallest (v7x, 64 MiB) if unknown."""
    try:
        cap = int(getattr(pltpu.get_tpu_info(), "vmem_capacity_bytes", 0))
        if cap > 0:
            return cap
    except Exception:
        pass
    return 64 << 20


# ----------------------------- Pallas matmul kernel -----------------------------
def _selfexpr_matmul_kernel(c_ref, x_ref, o_ref, acc_ref):
    """One (tm, d_pad) slab of  C @ X  accumulated over the k grid axis.

    Inputs are cast to bf16 per tile (VPU cast is free; avoids a separate HBM cast
    pass over C), accumulated in a single-buffered f32 VMEM scratch, and the HBM
    output block is written once, in its final dtype, on the last k step.
    """
    kk = pl.program_id(1)

    @pl.when(kk == 0)
    def _init():
        acc_ref[...] = jnp.zeros_like(acc_ref)

    acc_ref[...] += jnp.dot(
        c_ref[...].astype(jnp.bfloat16),
        x_ref[...].astype(jnp.bfloat16),
        preferred_element_type=jnp.float32,
    )

    @pl.when(kk == pl.num_programs(1) - 1)
    def _store():
        o_ref[...] = acc_ref[...].astype(o_ref.dtype)


def _pick_tiles(n_pad, d_pad, c_sz, x_sz, o_sz, budget):
    """Largest tiles that fit the VMEM budget; tk == n_pad means X is DMA'd once."""

    def cost(tm, tk):
        return (2 * tm * tk * c_sz          # double-buffered C tiles
                + 2 * tk * d_pad * x_sz     # double-buffered X slab
                + 2 * tm * d_pad * o_sz     # double-buffered output block
                + tm * d_pad * 4)           # resident f32 accumulator scratch

    tm_cands = sorted((t for t in range(8, min(n_pad, 1024) + 1, 8) if n_pad % t == 0),
                      reverse=True)
    tk_cands = sorted((t for t in range(128, min(n_pad, 2048) + 1, 128) if n_pad % t == 0),
                      reverse=True)
    tm_floor = min(n_pad, 256)

    tm = tk = None
    # Prefer the largest K tile (fewest ~0.35 us grid steps), but keep the row tile
    # >= 256 so MXU pushes stay full.
    for cand_tk in tk_cands:
        for cand_tm in tm_cands:
            if cand_tm >= tm_floor and cost(cand_tm, cand_tk) <= budget:
                tm, tk = cand_tm, cand_tk
                break
        if tm is not None:
            break
    if tm is None:
        # TODO(synk): for very large d_pad, add a blocked j (d) grid axis instead of
        # shrinking tm below the MXU-friendly floor.
        for cand_tk in tk_cands:
            for cand_tm in tm_cands:
                if cost(cand_tm, cand_tk) <= budget:
                    tm, tk = cand_tm, cand_tk
                    break
            if tm is not None:
                break
    if tm is None:
        tm, tk = tm_cands[-1], tk_cands[-1]

    # Give v7x's second TensorCore a row block when the grid would otherwise be a
    # single step.  Only when tk == n_pad (constant X block index => no X re-fetch),
    # so on single-TC v5e/v6e this costs just one extra grid step.
    if (tm == n_pad and tk == n_pad and n_pad // 2 >= 256 and n_pad % 16 == 0
            and cost(n_pad // 2, tk) <= budget):
        tm = n_pad // 2

    return tm, tk, cost(tm, tk)


def selfexpr_matmul(c, x, out_dtype):
    """o = c @ x on the MXU.  c: (n_pad, n_pad), x: (n_pad, d_pad), pre-padded/aligned."""
    n_pad, n_pad2 = c.shape
    n_pad3, d_pad = x.shape
    assert n_pad == n_pad2 == n_pad3, "Coefficient must be square and match X rows"
    assert n_pad % 128 == 0 and d_pad % 128 == 0

    cap = _vmem_capacity_bytes()
    budget = max(16 << 20, int(cap * 0.6))          # ~38 MiB on v7x, ~76 MiB on v5e/v6e
    c_sz = jnp.dtype(c.dtype).itemsize
    x_sz = jnp.dtype(x.dtype).itemsize
    o_sz = jnp.dtype(out_dtype).itemsize
    tm, tk, used = _pick_tiles(n_pad, d_pad, c_sz, x_sz, o_sz, budget)

    grid = (n_pad // tm, n_pad // tk)
    # `used` already counts double-buffering; just add headroom for Mosaic scratch and
    # never request the whole physical VMEM (v7x only has 64 MiB per core).
    vmem_limit = int(min(cap * 0.9, used + (16 << 20)))
    vmem_limit = max(vmem_limit, used + (2 << 20))

    return pl.pallas_call(
        _selfexpr_matmul_kernel,
        out_shape=jax.ShapeDtypeStruct((n_pad, d_pad), out_dtype),
        grid_spec=pltpu.PrefetchScalarGridSpec(
            num_scalar_prefetch=0,
            grid=grid,
            in_specs=[
                pl.BlockSpec((tm, tk), lambda i, kk: (i, kk)),      # Coefficient tile
                pl.BlockSpec((tk, d_pad), lambda i, kk: (kk, 0)),   # X slab, full width
            ],
            out_specs=pl.BlockSpec((tm, d_pad), lambda i, kk: (i, 0)),
            scratch_shapes=[pltpu.VMEM((tm, d_pad), jnp.float32)],
        ),
        compiler_params=pltpu.CompilerParams(
            dimension_semantics=("parallel", "arbitrary"),
            vmem_limit_bytes=vmem_limit,
        ),
    )(c, x)


# ------------------------- SelfExpressionLayer in JAX ---------------------------
def make_self_expression_coefficient(output_dim, domain_dim, batch_size, weight_c):
    """Deterministic parameter construction mirroring SelfExpression.__init__."""
    class_n = output_dim * batch_size * (domain_dim - 1)
    return jnp.full((class_n, class_n), weight_c, dtype=jnp.float32)


@jax.jit
def self_expression_layer_forward(coefficient, X, Y):
    """Equivalent of SelfExpressionLayer.forward == class_forward.

    Uses the identity  X_restored = Coefficient[inv] @ X[indices]  and picks, from
    HBM byte counts, whether to stream the raw f32 Coefficient (and un-sort the small
    output) or to row-gather the Coefficient in bf16 (no output un-sort).
    """
    n, d = X.shape
    assert coefficient.shape == (n, n)
    out_dtype = X.dtype

    indices = jnp.argsort(Y.reshape(-1))   # ascending label sort
    inv = jnp.argsort(indices)             # inverse permutation

    n_pad = _round_up(n, 128)
    d_pad = _round_up(d, 128)
    aligned = n_pad == n

    # X side (N*d elements): gather + bf16 cast fuse into one pass; zero row padding
    # keeps the padded K region of the reduction exact.
    x_sorted = jnp.take(X, indices, axis=0).astype(jnp.bfloat16)
    if n_pad != n or d_pad != d:
        x_sorted = jnp.pad(x_sorted, ((0, n_pad - n), (0, d_pad - d)))

    # Byte-count path choice (C is the dominant stream):
    #   raw-C path        ~ 4*N^2 (kernel reads f32 C once) + ~12*N*d (X gather + output un-sort)
    #   gathered-C path   ~ 6*N^2 (fused gather read f32 / write bf16) + 2*N^2 kernel, no un-sort
    # The raw-C path needs N already 128-aligned (padding f32 C would cost a full copy).
    if aligned and 3 * d <= n:
        zx = selfexpr_matmul(coefficient, x_sorted, out_dtype)[:n, :d]
        return jnp.take(zx, inv, axis=0)
    else:
        c_rows = jnp.take(coefficient, inv, axis=0).astype(jnp.bfloat16)  # fused gather+cast
        if n_pad != n:
            # Only when class_n is not a multiple of 128: one extra bf16 copy for padding.
            c_rows = jnp.pad(c_rows, ((0, n_pad - n), (0, n_pad - n)))
        out = selfexpr_matmul(c_rows, x_sorted, out_dtype)
        return out[:n, :d]


# ------------------------------------ main --------------------------------------
if __name__ == "__main__":
    # Three small configs covering both paths and the padding case:
    #   (4, 3, 16, 128): class_n = 128, d = 128 -> gathered-C path, no padding
    #   (4, 3, 20,  64): class_n = 160, d =  64 -> gathered-C path, padded to 256
    #   (4, 3, 32,  32): class_n = 256, d =  32 -> raw-f32-C path (d <= N/3)
    configs = [
        (4, 3, 16, 128),
        (4, 3, 20, 64),
        (4, 3, 32, 32),
    ]
    weight_c = 1.0e-4
    key = jax.random.PRNGKey(0)

    for (output_dim, domain_dim, batch_size, d_model) in configs:
        class_n = output_dim * batch_size * (domain_dim - 1)
        key, kc, kx, ky = jax.random.split(key, 4)

        # __init__ value (weight_c * ones), perturbed to mimic a trained Coefficient
        # (an all-constant C is permutation invariant and would hide permutation bugs).
        coeff = make_self_expression_coefficient(output_dim, domain_dim, batch_size, weight_c)
        coeff = coeff + 0.01 * jax.random.normal(kc, (class_n, class_n), dtype=jnp.float32)

        X = jax.random.normal(kx, (class_n, d_model), dtype=jnp.float32)
        Y = jax.random.randint(ky, (class_n,), 0, output_dim, dtype=jnp.int32)

        out = self_expression_layer_forward(coeff, X, Y)
        out = jax.block_until_ready(out)
        assert out.shape == (class_n, d_model)
        assert out.dtype == X.dtype

        # References: exact f32 semantics (loose tol, bf16 inputs in kernel) and
        # bf16-rounded inputs with f32 math (tight tol, checks kernel mechanics).
        idx = jnp.argsort(Y)
        inv = jnp.argsort(idx)
        ref_f32 = (coeff @ X[idx])[inv]
        c_bf = coeff.astype(jnp.bfloat16).astype(jnp.float32)
        x_bf = X.astype(jnp.bfloat16).astype(jnp.float32)
        ref_bf = (c_bf @ x_bf[idx])[inv]

        assert jnp.allclose(out, ref_bf, atol=2e-3, rtol=2e-3), "mismatch vs bf16 reference"
        assert jnp.allclose(out, ref_f32, atol=2e-2, rtol=2e-1), "mismatch vs f32 reference"

    print("KERNEL_OK")
</pallas_src>

<mosaic_0001>
module attributes {stable_mosaic.version = 11 : i64} {
  func.func @_selfexpr_matmul_kernel(%arg0: i32, %arg1: i32, %arg2: memref<128x128xbf16, #tpu.memory_space<vmem>>, %arg3: memref<128x128xbf16, #tpu.memory_space<vmem>>, %arg4: memref<128x128xf32, #tpu.memory_space<vmem>>, %arg5: memref<128x128xf32, #tpu.memory_space<vmem>>) attributes {dimension_semantics = [#tpu.dimension_semantics<parallel>, #tpu.dimension_semantics<arbitrary>], iteration_bounds = array<i64: 1, 1>, scalar_prefetch = 0 : i64, scratch_operands = 1 : i64, tpu.core_type = #tpu.core_type<tc>, window_params = [{transform_indices = @transform_0, window_bounds = array<i64: 128, 128>}, {transform_indices = @transform_1, window_bounds = array<i64: 128, 128>}, {transform_indices = @transform_2, window_bounds = array<i64: 128, 128>}]} {
    %c0_i32 = arith.constant 0 : i32
    %0 = arith.cmpi eq, %arg1, %c0_i32 : i32
    %1 = arith.extui %0 : i1 to i32
    %c0_i32_0 = arith.constant 0 : i32
    %2 = arith.cmpi ne, %1, %c0_i32_0 : i32
    scf.if %2 {
      %cst_10 = arith.constant 0.000000e+00 : f32
      %12 = vector.broadcast %cst_10 : f32 to vector<128x128xf32>
      %c0_11 = arith.constant 0 : index
      %c0_12 = arith.constant 0 : index
      %13 = vector.load %arg5[%c0_11, %c0_12] : memref<128x128xf32, #tpu.memory_space<vmem>>, vector<128x128xf32>
      tpu.vector_store %arg5[%c0_11, %c0_12], %12 {strides = array<i32>} : memref<128x128xf32, #tpu.memory_space<vmem>>, vector<128x128xf32>,
    } else {
    }
    %c0 = arith.constant 0 : index
    %c0_1 = arith.constant 0 : index
    %3 = vector.load %arg5[%c0, %c0_1] : memref<128x128xf32, #tpu.memory_space<vmem>>, vector<128x128xf32>
    %c0_2 = arith.constant 0 : index
    %c0_3 = arith.constant 0 : index
    %4 = vector.load %arg2[%c0_2, %c0_3] : memref<128x128xbf16, #tpu.memory_space<vmem>>, vector<128x128xbf16>
    %c0_4 = arith.constant 0 : index
    %c0_5 = arith.constant 0 : index
    %5 = vector.load %arg3[%c0_4, %c0_5] : memref<128x128xbf16, #tpu.memory_space<vmem>>, vector<128x128xbf16>
    %cst = arith.constant dense<0.000000e+00> : vector<128x128xf32>
    %6 = tpu.matmul %4, %5, %cst {dimension_numbers = #tpu.dot_dimension_numbers<[1], [0], [0], [1], [0, 0, 1, 1], [], []>} : vector<128x128xbf16>, vector<128x128xbf16>, vector<128x128xf32> -> vector<128x128xf32>
    %7 = arith.addf %3, %6 : vector<128x128xf32>
    %c0_6 = arith.constant 0 : index
    %c0_7 = arith.constant 0 : index
    %8 = vector.load %arg5[%c0_6, %c0_7] : memref<128x128xf32, #tpu.memory_space<vmem>>, vector<128x128xf32>
    tpu.vector_store %arg5[%c0_6, %c0_7], %7 {strides = array<i32>} : memref<128x128xf32, #tpu.memory_space<vmem>>, vector<128x128xf32>,
    %c0_i32_8 = arith.constant 0 : i32
    %9 = arith.cmpi eq, %arg1, %c0_i32_8 : i32
    %10 = arith.extui %9 : i1 to i32
    %c0_i32_9 = arith.constant 0 : i32
    %11 = arith.cmpi ne, %10, %c0_i32_9 : i32
    scf.if %11 {
      %c0_10 = arith.constant 0 : index
      %c0_11 = arith.constant 0 : index
      %12 = vector.load %arg5[%c0_10, %c0_11] : memref<128x128xf32, #tpu.memory_space<vmem>>, vector<128x128xf32>
      %c0_12 = arith.constant 0 : index
      %c0_13 = arith.constant 0 : index
      %13 = vector.load %arg4[%c0_12, %c0_13] : memref<128x128xf32, #tpu.memory_space<vmem>>, vector<128x128xf32>
      tpu.vector_store %arg4[%c0_12, %c0_13], %12 {strides = array<i32>} : memref<128x128xf32, #tpu.memory_space<vmem>>, vector<128x128xf32>,
    } else {
    }
    return
  }
  func.func @transform_0(%arg0: i32, %arg1: i32) -> (i32, i32) {
    %c0_i32 = arith.constant 0 : i32
    return %arg0, %arg1 : i32, i32
  }
  func.func @transform_1(%arg0: i32, %arg1: i32) -> (i32, i32) {
    %c0_i32 = arith.constant 0 : i32
    %c0_i32_0 = arith.constant 0 : i32
    return %arg1, %c0_i32 : i32, i32
  }
  func.func @transform_2(%arg0: i32, %arg1: i32) -> (i32, i32) {
    %c0_i32 = arith.constant 0 : i32
    %c0_i32_0 = arith.constant 0 : i32
    return %arg0, %c0_i32 : i32, i32
  }
}

</mosaic_0001>

<bundles_post_ra>
// kernel: self_expression_layer_forward.1
= control target key start
LH: loop header
LB: loop body
LE: loop exit
PB: predicated region body
PF: predicated region fallthrough
CT: control target
= control target key end

     0   :  { %s558_s0 = inlined_call_operand.vmem [shape: bf16[128,128], index: 0, kind: input, shape index: {}]   ;;  %s559_s1 = inlined_call_operand.vmem [shape: bf16[128,128], index: 1, kind: input, shape index: {}]   ;;  %s560_s2 = inlined_call_operand.hbm [shape: f32[128,128], index: 2, kind: output, shape index: {}]  }
   0x1   :  { %v440_v0 = vld [vmem:[%s559_s1] sm:$0xff]   ;;  %v441_v1 = vld [vmem:[%s559_s1 + $0x8] sm:$0xff]   ;;  %v442_v2 = vld [vmem:[%s559_s1 + $0x10] sm:$0xff]  }
   0x2   :  { %389 = vmatprep.subr.bf16.mxu0 %v440_v0  ;;  %421 = vmatprep.subr.bf16.mxu1 %v440_v0  ;;  %v443_v3 = vld [vmem:[%s559_s1 + $0x18] sm:$0xff]   ;;  %v448_v4 = vld [vmem:[%s558_s0] sm:$0xff]   ;;  %v445_v7 = vld [vmem:[%s559_s1 + $0x28] sm:$0xff]  }
   0x3   :  { %390 = vmatpush3.bf16.msra.mxu0 %v440_v0  ;;  %429 = vmatpush3.bf16.msra.mxu1 %v440_v0  ;;  %v449_v5 = vld [vmem:[%s558_s0 + $0x20] sm:$0xff]  }
   0x4   :  { %391 = vmatprep.subr.bf16.mxu0 %v441_v1  ;;  %422 = vmatprep.subr.bf16.mxu1 %v441_v1  ;;  %v444_v6 = vld [vmem:[%s559_s1 + $0x20] sm:$0xff]  }
   0x5   :  { %405 = vmatprep.mubr.bf16.mxu0 %v448_v4  ;;  %413 = vmatprep.mubr.bf16.mxu1 %v449_v5 }
   0x7   :  { %392 = vmatpush3.bf16.msra.mxu0 %v441_v1  ;;  %430 = vmatpush3.bf16.msra.mxu1 %v441_v1 }
   0x8   :  { %393 = vmatprep.subr.bf16.mxu0 %v442_v2  ;;  %423 = vmatprep.subr.bf16.mxu1 %v442_v2 }
   0xb   :  { %394 = vmatpush3.bf16.msra.mxu0 %v442_v2  ;;  %431 = vmatpush3.bf16.msra.mxu1 %v442_v2 }
   0xc   :  { %395 = vmatprep.subr.bf16.mxu0 %v443_v3  ;;  %424 = vmatprep.subr.bf16.mxu1 %v443_v3 }
   0xf   :  { %396 = vmatpush3.bf16.msra.mxu0 %v443_v3  ;;  %432 = vmatpush3.bf16.msra.mxu1 %v443_v3 }
  0x10   :  { %397 = vmatprep.subr.bf16.mxu0 %v444_v6  ;;  %425 = vmatprep.subr.bf16.mxu1 %v444_v6 }
  0x11   :  { %7 = vsyncpa [#allocation4], 0  ;;  %v446_v8 = vld [vmem:[%s559_s1 + $0x30] sm:$0xff]   ;;  %v447_v9 = vld [vmem:[%s559_s1 + $0x38] sm:$0xff]   ;;  %s480_s12 = smov [#allocation3]  }
  0x12   :  { %v450_v10 = vld [vmem:[%s558_s0 + $0x8] sm:$0xff]   ;;  %v452_v12 = vld [vmem:[%s558_s0 + $0x10] sm:$0xff]   ;;  %v454_v14 = vld [vmem:[%s558_s0 + $0x18] sm:$0xff]  }
  0x13   :  { %398 = vmatpush3.bf16.msra.mxu0 %v444_v6  ;;  %433 = vmatpush3.bf16.msra.mxu1 %v444_v6  ;;  %v451_v11 = vld [vmem:[%s558_s0 + $0x28] sm:$0xff]   ;;  %v453_v13 = vld [vmem:[%s558_s0 + $0x30] sm:$0xff]   ;;  %v455_v15 = vld [vmem:[%s558_s0 + $0x38] sm:$0xff]   ;;  %s346_s0 = sshll.u32 %s480_s12, 4  ;;  %s347_s0 = int_to_ptr.vmem [resolvable:$true] %s346_s0 }
  0x14   :  { %399 = vmatprep.subr.bf16.mxu0 %v445_v7  ;;  %426 = vmatprep.subr.bf16.mxu1 %v445_v7  ;;  %s456_s13 = scalar_lea.vmem %s347_s0, 2048  ;;  %p461_p1 = scmp.lt.s32.totalorder %s347_s0, %s347_s0 }
  0x15   :  { %p457_p0 = scmp.ne.s32.totalorder %s347_s0, %s456_s13  ;;  %p462_p2 = scmp.lt.s32.totalorder %s456_s13, %s456_s13 }
  0x17   :  { %400 = vmatpush3.bf16.msra.mxu0 %v445_v7  ;;  %434 = vmatpush3.bf16.msra.mxu1 %v445_v7  ;;  %p463_p3 = por %p462_p2, %p461_p1 }
  0x18   :  { %401 = vmatprep.subr.bf16.mxu0 %v446_v8  ;;  %427 = vmatprep.subr.bf16.mxu1 %v446_v8 }
  0x19   :  { %p464_p4 = pnand %p463_p3, %p457_p0 }
  0x1b   :  { %402 = vmatpush3.bf16.msra.mxu0 %v446_v8  ;;  %435 = vmatpush3.bf16.msra.mxu1 %v446_v8 }
  0x1c   :  { %403 = vmatprep.subr.bf16.mxu0 %v447_v9  ;;  %428 = vmatprep.subr.bf16.mxu1 %v447_v9 }
  0x1f   :  { %404 = vmatpush3.bf16.msra.mxu0 %v447_v9  ;;  %436 = vmatpush3.bf16.msra.mxu1 %v447_v9 }
  0x22   :  { %406 = vmatmul.mubr.bf16.vlgmr.msra.gmra.mrb[0].mxu0 %v450_v10  ;;  %414 = vmatmul.mubr.bf16.vlgmr.msra.gmra.mrb[0].mxu1 %v451_v11 }
  0x23   :  { %409 = vmatprep.mubr.bf16.mxu0 %v452_v12  ;;  %417 = vmatprep.mubr.bf16.mxu1 %v453_v13 }
  0x2a   :  { %410 = vmatmul.mubr.bf16.gmra.mrb[4].mxu0 %v454_v14  ;;  %418 = vmatmul.mubr.bf16.gmra.mrb[4].mxu1 %v455_v15 }
  0xf5   :  { %v407_v16 = vpop.f32.mrb[0].mxu0  ;;  %v415_v17 = vpop.f32.mrb[0].mxu1 }
  0xf6   :  { %327 = vst [vmem:[#allocation3 + $0x10] sm:$0xff] %v407_v16  ;;  %335 = vst [vmem:[#allocation3 + $0x50] sm:$0xff] %v415_v17  ;;  %v211_v18 = vpop.f32.mrb[1].mxu0  ;;  %v243_v19 = vpop.f32.mrb[1].mxu1 }
  0xf7   :  { %325 = vst [vmem:[#allocation3] sm:$0xff] %v211_v18  ;;  %333 = vst [vmem:[#allocation3 + $0x40] sm:$0xff] %v243_v19  ;;  %v408_v20 = vpop.f32.mrb[2].mxu0  ;;  %v416_v21 = vpop.f32.mrb[2].mxu1 }
  0xf8   :  { %328 = vst [vmem:[#allocation3 + $0x18] sm:$0xff] %v408_v20  ;;  %336 = vst [vmem:[#allocation3 + $0x58] sm:$0xff] %v416_v21  ;;  %v214_v22 = vpop.f32.mrb[3].mxu0  ;;  %v246_v23 = vpop.f32.mrb[3].mxu1 }
  0xf9   :  { %326 = vst [vmem:[#allocation3 + $0x8] sm:$0xff] %v214_v22  ;;  %334 = vst [vmem:[#allocation3 + $0x48] sm:$0xff] %v246_v23 }
  0xfd   :  { %v411_v24 = vpop.f32.mrb[4].mxu0  ;;  %v419_v25 = vpop.f32.mrb[4].mxu1 }
  0xfe   :  { %331 = vst [vmem:[#allocation3 + $0x30] sm:$0xff] %v411_v24  ;;  %339 = vst [vmem:[#allocation3 + $0x70] sm:$0xff] %v419_v25  ;;  %v227_v26 = vpop.f32.mrb[5].mxu0  ;;  %v259_v27 = vpop.f32.mrb[5].mxu1 }
  0xff   :  { %329 = vst [vmem:[#allocation3 + $0x20] sm:$0xff] %v227_v26  ;;  %337 = vst [vmem:[#allocation3 + $0x60] sm:$0xff] %v259_v27  ;;  %v412_v28 = vpop.f32.mrb[6].mxu0  ;;  %v420_v29 = vpop.f32.mrb[6].mxu1 }
 0x100   :  { %332 = vst [vmem:[#allocation3 + $0x38] sm:$0xff] %v412_v28  ;;  %340 = vst [vmem:[#allocation3 + $0x78] sm:$0xff] %v420_v29  ;;  %v230_v30 = vpop.f32.mrb[7].mxu0  ;;  %v262_v31 = vpop.f32.mrb[7].mxu1 }
 0x101   :  { %330 = vst [vmem:[#allocation3 + $0x28] sm:$0xff] %v230_v30  ;;  %338 = vst [vmem:[#allocation3 + $0x68] sm:$0xff] %v262_v31 }
 0x102   :  { %467 = shalt.err (!%p464_p4)
}
 0x103   :  { %s468_s16 = scalar_lea.hbm %s560_s2, 2048 }
 0x104   :  { %p469_p5 = scmp.ne.s32.totalorder %s560_s2, %s468_s16  ;;  %p472_p6 = scmp.lt.u32.totalorder %s468_s16, %s560_s2 }
 0x106   :  { %p474_p7 = pnand %p472_p6, %p469_p5 }
 0x108   :  { %477 = shalt.err (!%p474_p7)
}
 0x109   :  { %s481_s21 = smov 128   ;;  %s482_s22 = smov 8  }
 0x10a   :  { %352 = dma.vmem_to_hbm [thread:$0]  %s347_s0, 2048, %s560_s2, [#allocation4], %s481_s21, %s481_s21, %s482_s22  }
 0x10b   :  { %478 = dma.done.wait [#allocation4], 2048  }
 0x10c   :  { %479 = vsyncadd [#allocation4], 4294965248 }
 0x10d   :  { %356 = vsyncpa [#allocation4], 1 }

</bundles_post_ra>
